<compile_context>
chip_gen: v6e
topology: v6e:2x2x1
jax: 0.10.0
libtpu: 0.0.40
codegen_flags: <defaults>
</compile_context>

<pallas_src>
import functools

import jax
import jax.numpy as jnp
from jax.experimental import pallas as pl
from jax.experimental.pallas import tpu as pltpu

_LANES = 128
_SUBLANES = 8


def _round_up(x, m):
    return (x + m - 1) // m * m


def _is_v7x():
    try:
        return "v7" in jax.devices()[0].device_kind.lower()
    except Exception:
        return False


def _sq_diff_sum_jnp(x, t):
    d = x.astype(jnp.float32) - t.astype(jnp.float32)
    return jnp.sum(d * d)


def _content_loss_kernel(x_ref, t_ref, o_ref, *, rows, br, steps_per_split,
                         needs_mask):
    s = pl.program_id(0)   # split axis (CORE_PARALLEL on v7x, size 1 otherwise)
    i = pl.program_id(1)   # reduction axis ("arbitrary")

    @pl.when(i == 0)
    def _():
        o_ref[...] = jnp.zeros_like(o_ref)

    x = x_ref[...].astype(jnp.float32)
    t = t_ref[...].astype(jnp.float32)
    d = x - t

    if needs_mask:
        # Rows at/after `rows` belong to an out-of-bounds trailing block region:
        # their contents are undefined and must be zeroed before accumulation.
        row0 = (s * steps_per_split + i) * br
        ridx = jax.lax.broadcasted_iota(jnp.int32, (br, _LANES), 0)
        d = jnp.where(row0 + ridx < rows, d, 0.0)

    sq = d * d
    # Fold (br,128) -> (8,128) with VPU adds only (splitting the leading dim is
    # a layout no-op, no (8,128) tile crossing -> no materialized VMEM temp).
    o_ref[...] += jnp.sum(sq.reshape(br // _SUBLANES, _SUBLANES, _LANES), axis=0)


def content_loss_forward(x, target, weight):
    """Returns (input_unchanged, mse_loss_scalar) matching content_loss.forward.

    Accepts f32 or bf16 inputs; accumulation is f32 either way.
    """
    assert x.shape == target.shape, "input/target shape mismatch"
    n_elems = x.size
    # weight^2 / N applied once in the wrapper (works with traced weight too).
    scale = (jnp.float32(weight) * jnp.float32(weight)) / jnp.float32(n_elems)

    # Fallback: non-128-divisible element counts or tiny inputs -> one fused
    # jnp pass (no pad copies, no per-call pallas overhead).
    if n_elems % _LANES != 0 or n_elems < _SUBLANES * _LANES:
        return x, _sq_diff_sum_jnp(x, target) * scale

    rows = n_elems // _LANES
    x2 = x.reshape(rows, _LANES)        # contiguous reshape: no HBM copy
    t2 = target.reshape(rows, _LANES)

    is_v7x = _is_v7x()
    block_rows_cap = 8192 if is_v7x else 4096   # 4 MiB vs 2 MiB per input block

    br = min(block_rows_cap, _round_up(rows, _SUBLANES))
    total_steps = pl.cdiv(rows, br)

    # 2-way split only where it can land on two TensorCores (v7x) and each
    # split gets a few blocks; single reduction chain on v5e/v6e.
    num_splits = 2 if (is_v7x and total_steps >= 4) else 1
    steps_per_split = pl.cdiv(total_steps, num_splits)
    needs_mask = (num_splits * steps_per_split * br) != rows

    kernel = functools.partial(
        _content_loss_kernel,
        rows=rows, br=br, steps_per_split=steps_per_split, needs_mask=needs_mask)

    lead_sem = pltpu.CORE_PARALLEL if (is_v7x and num_splits == 2) else pltpu.ARBITRARY
    compiler_params = pltpu.CompilerParams(
        dimension_semantics=(lead_sem, pltpu.ARBITRARY),
        vmem_limit_bytes=(48 << 20) if is_v7x else (32 << 20),
    )

    partials = pl.pallas_call(
        kernel,
        out_shape=jax.ShapeDtypeStruct((num_splits * _SUBLANES, _LANES),
                                       jnp.float32),
        grid_spec=pltpu.PrefetchScalarGridSpec(
            num_scalar_prefetch=0,
            grid=(num_splits, steps_per_split),
            in_specs=[
                pl.BlockSpec((br, _LANES), lambda s, i: (s * steps_per_split + i, 0)),
                pl.BlockSpec((br, _LANES), lambda s, i: (s * steps_per_split + i, 0)),
            ],
            out_specs=pl.BlockSpec((_SUBLANES, _LANES), lambda s, i: (s, 0)),
        ),
        compiler_params=compiler_params,
    )(x2, t2)

    loss = jnp.sum(partials) * scale

    # input.clone(): returning x is semantically identical (immutability).
    return x, loss


if __name__ == "__main__":
    key = jax.random.PRNGKey(0)
    kx, kt = jax.random.split(key)
    weight = 0.5  # deterministic content weight

    def _ref_loss(a, b):
        a32 = a.astype(jnp.float32)
        b32 = b.astype(jnp.float32)
        return jnp.mean((a32 * weight - b32 * weight) ** 2)

    # 1) Small conv-feature-map-like shape (NCHW), 128-divisible -> Pallas path.
    N, C, H, W = 2, 4, 16, 16
    x = jax.random.normal(kx, (N, C, H, W), dtype=jnp.float32)
    target = jax.random.normal(kt, (N, C, H, W), dtype=jnp.float32)
    clone, loss = content_loss_forward(x, target, weight)
    jax.block_until_ready((clone, loss))
    assert jnp.allclose(clone, x), "clone path mismatch"
    assert jnp.allclose(loss, _ref_loss(x, target), rtol=1e-5, atol=1e-6), \
        "loss mismatch (aligned pallas path)"

    # 2) 128-divisible but rows % 8 != 0 -> exercises in-kernel OOB row masking.
    x2 = jax.random.normal(kx, (1, 4, 26, 64), dtype=jnp.float32)   # 6656 = 52*128
    t2 = jax.random.normal(kt, (1, 4, 26, 64), dtype=jnp.float32)
    _, loss2 = content_loss_forward(x2, t2, weight)
    jax.block_until_ready(loss2)
    assert jnp.allclose(loss2, _ref_loss(x2, t2), rtol=1e-5, atol=1e-6), \
        "loss mismatch (masked-tail pallas path)"

    # 3) Non-128-divisible element count -> jnp fallback path (no pad copies).
    x3 = jax.random.normal(kx, (1, 3, 13, 13), dtype=jnp.float32)   # 507 elems
    t3 = jax.random.normal(kt, (1, 3, 13, 13), dtype=jnp.float32)
    _, loss3 = content_loss_forward(x3, t3, weight)
    jax.block_until_ready(loss3)
    assert jnp.allclose(loss3, _ref_loss(x3, t3), rtol=1e-5, atol=1e-6), \
        "loss mismatch (jnp fallback path)"

    # 4) bf16 inputs (halved HBM traffic); accumulation still f32.
    xb = x.astype(jnp.bfloat16)
    tb = target.astype(jnp.bfloat16)
    _, loss4 = content_loss_forward(xb, tb, weight)
    jax.block_until_ready(loss4)
    assert jnp.allclose(loss4, _ref_loss(xb, tb), rtol=1e-5, atol=1e-6), \
        "loss mismatch (bf16 pallas path)"

    # TODO(synk): backward()/autograd graph state has no Pallas forward analog.
    print("KERNEL_OK")
</pallas_src>

<mosaic_0001>
module attributes {stable_mosaic.version = 11 : i64} {
  func.func @_content_loss_kernel(%arg0: i32, %arg1: i32, %arg2: memref<16x128xf32, #tpu.memory_space<vmem>>, %arg3: memref<16x128xf32, #tpu.memory_space<vmem>>, %arg4: memref<8x128xf32, #tpu.memory_space<vmem>>) attributes {dimension_semantics = [#tpu.dimension_semantics<arbitrary>, #tpu.dimension_semantics<arbitrary>], iteration_bounds = array<i64: 1, 1>, scalar_prefetch = 0 : i64, scratch_operands = 0 : i64, tpu.core_type = #tpu.core_type<tc>, window_params = [{transform_indices = @transform_0, window_bounds = array<i64: 16, 128>}, {transform_indices = @transform_1, window_bounds = array<i64: 16, 128>}, {transform_indices = @transform_2, window_bounds = array<i64: 8, 128>}]} {
    %c0_i32 = arith.constant 0 : i32
    %0 = arith.cmpi eq, %arg1, %c0_i32 : i32
    %1 = arith.extui %0 : i1 to i32
    %c0_i32_0 = arith.constant 0 : i32
    %2 = arith.cmpi ne, %1, %c0_i32_0 : i32
    scf.if %2 {
      %cst_8 = arith.constant 0.000000e+00 : f32
      %12 = vector.broadcast %cst_8 : f32 to vector<8x128xf32>
      %c0_9 = arith.constant 0 : index
      %c0_10 = arith.constant 0 : index
      %13 = vector.load %arg4[%c0_9, %c0_10] : memref<8x128xf32, #tpu.memory_space<vmem>>, vector<8x128xf32>
      tpu.vector_store %arg4[%c0_9, %c0_10], %12 {strides = array<i32>} : memref<8x128xf32, #tpu.memory_space<vmem>>, vector<8x128xf32>,
    } else {
    }
    %c0 = arith.constant 0 : index
    %c0_1 = arith.constant 0 : index
    %3 = vector.load %arg2[%c0, %c0_1] : memref<16x128xf32, #tpu.memory_space<vmem>>, vector<16x128xf32>
    %c0_2 = arith.constant 0 : index
    %c0_3 = arith.constant 0 : index
    %4 = vector.load %arg3[%c0_2, %c0_3] : memref<16x128xf32, #tpu.memory_space<vmem>>, vector<16x128xf32>
    %5 = arith.subf %3, %4 : vector<16x128xf32>
    %6 = arith.mulf %5, %5 : vector<16x128xf32>
    %c0_4 = arith.constant 0 : index
    %c0_5 = arith.constant 0 : index
    %7 = vector.load %arg4[%c0_4, %c0_5] : memref<8x128xf32, #tpu.memory_space<vmem>>, vector<8x128xf32>
    %8 = vector.shape_cast %6 : vector<16x128xf32> to vector<2x8x128xf32>
    %cst = arith.constant dense<0.000000e+00> : vector<8x128xf32>
    %9 = vector.multi_reduction <add>, %8, %cst [0] : vector<2x8x128xf32> to vector<8x128xf32>
    %10 = arith.addf %7, %9 : vector<8x128xf32>
    %c0_6 = arith.constant 0 : index
    %c0_7 = arith.constant 0 : index
    %11 = vector.load %arg4[%c0_6, %c0_7] : memref<8x128xf32, #tpu.memory_space<vmem>>, vector<8x128xf32>
    tpu.vector_store %arg4[%c0_6, %c0_7], %10 {strides = array<i32>} : memref<8x128xf32, #tpu.memory_space<vmem>>, vector<8x128xf32>,
    return
  }
  func.func @transform_0(%arg0: i32, %arg1: i32) -> (i32, i32) {
    %c1_i32 = arith.constant 1 : i32
    %0 = arith.muli %arg0, %c1_i32 : i32
    %1 = arith.addi %0, %arg1 : i32
    %c0_i32 = arith.constant 0 : i32
    %c0_i32_0 = arith.constant 0 : i32
    return %1, %c0_i32 : i32, i32
  }
  func.func @transform_1(%arg0: i32, %arg1: i32) -> (i32, i32) {
    %c1_i32 = arith.constant 1 : i32
    %0 = arith.muli %arg0, %c1_i32 : i32
    %1 = arith.addi %0, %arg1 : i32
    %c0_i32 = arith.constant 0 : i32
    %c0_i32_0 = arith.constant 0 : i32
    return %1, %c0_i32 : i32, i32
  }
  func.func @transform_2(%arg0: i32, %arg1: i32) -> (i32, i32) {
    %c0_i32 = arith.constant 0 : i32
    %c0_i32_0 = arith.constant 0 : i32
    return %arg0, %c0_i32 : i32, i32
  }
}

</mosaic_0001>

<bundles_post_ra>
// kernel: tpu_custom_call.1
= control target key start
LH: loop header
LB: loop body
LE: loop exit
PB: predicated region body
PF: predicated region fallthrough
CT: control target
= control target key end

     0   :  { %7 = vsyncpa [#allocation3], 0  ;;  %s186_s0 = inlined_call_operand.hbm [shape: f32[16,128], index: 0, kind: input, shape index: {}]   ;;  %s187_s1 = inlined_call_operand.hbm [shape: f32[16,128], index: 1, kind: input, shape index: {}]   ;;  %s188_s2 = inlined_call_operand.hbm [shape: f32[8,128], index: 2, kind: output, shape index: {}]  }
   0x1   :  { %8 = vsyncpa [#allocation6], 0 }
   0x2   :  { %9 = vsyncpa [#allocation4], 0  ;;  %s157_s9 = smov [#allocation2]  }
   0x3   :  { %s19_s10 = sshll.u32 %s157_s9, 4  ;;  %s20_s10 = int_to_ptr.vmem [resolvable:$true] %s19_s10 }
   0x4   :  { %s99_s11 = scalar_lea.vmem %s20_s10, 256  ;;  %p104_p1 = scmp.lt.s32.totalorder %s20_s10, %s20_s10 }
   0x5   :  { %p100_p0 = scmp.ne.s32.totalorder %s20_s10, %s99_s11  ;;  %p105_p2 = scmp.lt.s32.totalorder %s99_s11, %s99_s11 }
   0x7   :  { %p106_p3 = por %p105_p2, %p104_p1 }
   0x9   :  { %p107_p4 = pnand %p106_p3, %p100_p0 }
   0xb   :  { %110 = shalt.err (!%p107_p4)
}
   0xc   :  { %s158_s12 = smov 128   ;;  %s159_s13 = smov 8  }
   0xd   :  { %25 = dma.hbm_to_vmem [thread:$0]  %s186_s0, 256, %s20_s10, [#allocation3], %s158_s12, %s158_s12, %s159_s13  }
   0xe   :  { %s160_s16 = smov [#allocation5]  }
   0xf   :  { %s35_s17 = sshll.u32 %s160_s16, 4  ;;  %s36_s17 = int_to_ptr.vmem [resolvable:$true] %s35_s17 }
  0x10   :  { %s119_s18 = scalar_lea.vmem %s36_s17, 256  ;;  %p124_p6 = scmp.lt.s32.totalorder %s36_s17, %s36_s17 }
  0x11   :  { %p120_p5 = scmp.ne.s32.totalorder %s36_s17, %s119_s18  ;;  %p125_p7 = scmp.lt.s32.totalorder %s119_s18, %s119_s18 }
  0x13   :  { %p126_p8 = por %p125_p7, %p124_p6 }
  0x15   :  { %p127_p9 = pnand %p126_p8, %p120_p5 }
  0x17   :  { %130 = shalt.err (!%p127_p9)
}
  0x18   :  { %41 = dma.hbm_to_vmem [thread:$0]  %s187_s1, 256, %s36_s17, [#allocation6], %s158_s12, %s158_s12, %s159_s13  }
  0x19   :  { %151 = dma.done.wait [#allocation3], 256  }
  0x1a   :  { %152 = vsyncadd [#allocation3], 4294967040 }
  0x1b   :  { %153 = dma.done.wait [#allocation6], 256  }
  0x1c   :  { %154 = vsyncadd [#allocation6], 4294967040  ;;  %v57_v0 = vld [vmem:[#allocation2] sm:$0xff]  ;;  %v58_v1 = vld [vmem:[#allocation2 + $0x8] sm:$0xff]  ;;  %s161_s0 = smov [#allocation7]  }
  0x1d   :  { %v59_v2 = vld [vmem:[#allocation5] sm:$0xff]  ;;  %v60_v3 = vld [vmem:[#allocation5 + $0x8] sm:$0xff]  ;;  %s75_s21 = sshll.u32 %s161_s0, 4  ;;  %s76_s21 = int_to_ptr.vmem [resolvable:$true] %s75_s21 }
  0x1e   :  { %v61_v4 = vsub.f32 %v57_v0, %v59_v2  ;;  %v62_v5 = vsub.f32 %v58_v1, %v60_v3  ;;  %s131_s22 = scalar_lea.vmem %s76_s21, 128  ;;  %p136_p11 = scmp.lt.s32.totalorder %s76_s21, %s76_s21 }
  0x1f   :  { %p132_p10 = scmp.ne.s32.totalorder %s76_s21, %s131_s22  ;;  %p137_p12 = scmp.lt.s32.totalorder %s131_s22, %s131_s22 }
  0x20   :  { %v63_v6 = vmul.f32 %v61_v4, %v61_v4  ;;  %v64_v7 = vmul.f32 %v62_v5, %v62_v5 }
  0x21   :  { %p138_p13 = por %p137_p12, %p136_p11 }
  0x22   :  { %v66_v8 = vadd.f32 %v64_v7, %v63_v6 }
  0x23   :  { %p139_p0 = pnand %p138_p13, %p132_p10 }
  0x24   :  { %68 = vst [vmem:[#allocation7] sm:$0xff] %v66_v8 }
  0x25   :  { %142 = shalt.err (!%p139_p0)
}
  0x26   :  { %78 = dma.vmem_to_hbm [thread:$0]  %s76_s21, 128, %s188_s2, [#allocation4]  }
  0x27   :  { %155 = dma.done.wait [#allocation4], 128  }
  0x28   :  { %156 = vsyncadd [#allocation4], 4294967168 }
  0x29   :  { %82 = vsyncpa [#allocation3], 1 }
  0x2a   :  { %83 = vsyncpa [#allocation6], 1 }
  0x2b   :  { %84 = vsyncpa [#allocation4], 1 }

</bundles_post_ra>
